<compile_context>
chip_gen: v7x
topology: tpu7x:2x2x1
jax: 0.10.0
libtpu: 0.0.40
codegen_flags: <defaults>
</compile_context>

<pallas_src>
import functools

import jax
import jax.numpy as jnp
from jax import lax
from jax.experimental import pallas as pl
from jax.experimental.pallas import tpu as pltpu


# --------------------------------------------------------------------------
# helpers
# --------------------------------------------------------------------------
def _vmem_capacity_bytes():
    """Physical VMEM per TensorCore; conservative fallback if query fails."""
    try:
        info = pltpu.get_tpu_info()
        for attr in ("vmem_capacity_bytes", "vmem_size_bytes"):
            cap = getattr(info, attr, None)
            if cap:
                return int(cap)
    except Exception:
        pass
    return 64 << 20  # v7x per-TC VMEM: safe lower bound on all generations


def _vmem_limit(needed_bytes, cap_bytes):
    return int(min(int(cap_bytes * 0.9), max(int(needed_bytes), 32 << 20)))


# --------------------------------------------------------------------------
# fused kernel: a batch of Nb whole images resident in VMEM per grid step
# --------------------------------------------------------------------------
def _se_fused_kernel(x_ref, w1t_ref, b1_ref, w2t_ref, b2_ref, o_ref, *, inv_hw):
    x = x_ref[...]                                             # [Nb, C, HW] native dtype
    # Global average pool: lane reduction with f32 accumulation.
    gap = jnp.sum(x, axis=-1, dtype=jnp.float32) * inv_hw      # [Nb, C]
    # conv_reduce (1x1 conv == matmul, pre-transposed weights) + bias, SWISH.
    h = jnp.dot(gap, w1t_ref[...], preferred_element_type=jnp.float32) + b1_ref[...]
    h = h * jax.nn.sigmoid(h)                                  # [Nb, Cr]
    # conv_expand + bias, SIGMOID.
    e = jax.nn.sigmoid(
        jnp.dot(h, w2t_ref[...], preferred_element_type=jnp.float32) + b2_ref[...]
    )                                                          # [Nb, C]
    # Scale the resident block (broadcast over the lane/spatial axis).
    # NOTE: for sub-f32 x the excitation is cast down before the multiply
    # (standard mixed-precision behaviour).
    o_ref[...] = x * e.astype(x.dtype)[:, :, None]


# --------------------------------------------------------------------------
# tiled fallback (large-spatial stages that do not fit the VMEM budget)
#   kernel A: stream HW tiles, accumulate GAP, compute excitation e [N, C, 1]
#   kernel B: stream HW tiles again and rescale x by e
# --------------------------------------------------------------------------
def _se_gap_excite_kernel(x_ref, w1t_ref, b1_ref, w2t_ref, b2_ref, e_ref,
                          acc_ref, *, inv_hw, hw, tile_hw, need_mask):
    t = pl.program_id(1)

    @pl.when(t == 0)
    def _():
        acc_ref[...] = jnp.zeros_like(acc_ref)

    x = x_ref[...]                                             # [1, C, T]
    if need_mask:
        lane = lax.broadcasted_iota(jnp.int32, x.shape, 2)
        valid = (lane + t * tile_hw) < hw
        x = jnp.where(valid, x, jnp.zeros_like(x))             # zero OOB lanes
    acc_ref[...] += jnp.sum(x, axis=-1, dtype=jnp.float32)     # [1, C]

    @pl.when(t == pl.num_programs(1) - 1)
    def _():
        gap = acc_ref[...] * inv_hw
        h = jnp.dot(gap, w1t_ref[...], preferred_element_type=jnp.float32) + b1_ref[...]
        h = h * jax.nn.sigmoid(h)
        e = jax.nn.sigmoid(
            jnp.dot(h, w2t_ref[...], preferred_element_type=jnp.float32) + b2_ref[...]
        )
        e_ref[...] = e[:, :, None]                             # [1, C, 1] f32


def _se_scale_kernel(x_ref, e_ref, o_ref):
    x = x_ref[...]                                             # [1, C, T]
    o_ref[...] = x * e_ref[...].astype(x.dtype)                # e: [1, C, 1]


# --------------------------------------------------------------------------
# wrapper
# --------------------------------------------------------------------------
def se_block(x_nchw, w1, b1, w2, b2, *, force_tiled=False, tile_hw=None):
    """x_nchw: [N, C, H, W]; w1: [Cr, C]; b1: [Cr]; w2: [C, Cr]; b2: [C]."""
    N, C, H, W = x_nchw.shape
    Cr = w1.shape[0]
    HW = H * W
    itemsize = jnp.dtype(x_nchw.dtype).itemsize
    inv_hw = 1.0 / float(HW)

    # NCHW -> [N, C, HW]: a pure reshape (free bitcast), no pad, no slice.
    x_flat = x_nchw.reshape(N, C, HW)

    # Hoist weight transposes out of the kernel (no in-loop XLU transpose).
    w1_t = w1.T                          # [C, Cr]
    w2_t = w2.T                          # [Cr, C]
    b1_2d = b1.reshape(1, Cr)
    b2_2d = b2.reshape(1, C)
    params = (w1_t, b1_2d, w2_t, b2_2d)
    param_bytes = sum(int(a.size) * jnp.dtype(a.dtype).itemsize for a in params)

    vmem_cap = _vmem_capacity_bytes()
    # BlockSpec double-buffers each input and the output (2x(in+out)); leave
    # headroom for compiler-internal scratch and the (small) parameters.
    budget = int(vmem_cap * 0.85) - 2 * param_bytes - (2 << 20)
    budget = max(budget, 2 << 20)

    per_image_bytes = C * HW * itemsize
    fused_ok = (not force_tiled) and (4 * per_image_bytes <= budget)

    if fused_ok:
        # Batch images per grid step: ~<=4 MiB block so 2x(in+out) buffering
        # stays well inside v7x's 64 MiB VMEM while DMAs stay large.
        target_block = min(4 << 20, budget // 4)
        nb = max(1, min(N, target_block // per_image_bytes))
        grid_n = pl.cdiv(N, nb)
        block_bytes = nb * per_image_bytes

        needed = 4 * block_bytes + 2 * param_bytes + (2 << 20)
        cost = pl.CostEstimate(
            flops=int(2 * N * C * HW + 4 * N * C * Cr),
            transcendentals=int(N * (C + Cr)),
            bytes_accessed=int(2 * N * C * HW * itemsize + 2 * param_bytes),
        )

        out = pl.pallas_call(
            functools.partial(_se_fused_kernel, inv_hw=inv_hw),
            out_shape=jax.ShapeDtypeStruct((N, C, HW), x_nchw.dtype),
            grid=(grid_n,),
            in_specs=[
                pl.BlockSpec((nb, C, HW), lambda n: (n, 0, 0)),
                pl.BlockSpec((C, Cr), lambda n: (0, 0)),
                pl.BlockSpec((1, Cr), lambda n: (0, 0)),
                pl.BlockSpec((Cr, C), lambda n: (0, 0)),
                pl.BlockSpec((1, C), lambda n: (0, 0)),
            ],
            out_specs=pl.BlockSpec((nb, C, HW), lambda n: (n, 0, 0)),
            compiler_params=pltpu.CompilerParams(
                # TODO(synk): on v7x verify in xprof that both TensorCores pick
                # up the N axis; if not, switch to pltpu.CORE_PARALLEL.
                dimension_semantics=("parallel",),
                vmem_limit_bytes=_vmem_limit(needed, vmem_cap),
            ),
            cost_estimate=cost,
        )(x_flat, w1_t, b1_2d, w2_t, b2_2d)
        return out.reshape(N, C, H, W)

    # ---------------- tiled fallback: stream lane-dense HW tiles ----------
    if tile_hw is not None:
        t_hw = int(tile_hw)
    else:
        # ~1 MiB of x per tile -> ~4 MiB working set in the scale kernel.
        t_hw = (((1 << 20) // max(1, C * itemsize)) // 128) * 128
        t_hw = max(128, t_hw)
    if t_hw >= HW:
        t_hw = HW
    grid_hw = pl.cdiv(HW, t_hw)
    need_mask = (HW % t_hw) != 0
    tile_bytes = C * t_hw * itemsize

    cost_a = pl.CostEstimate(
        flops=int(N * C * HW + 4 * N * C * Cr),
        transcendentals=int(N * (C + Cr)),
        bytes_accessed=int(N * C * HW * itemsize + 2 * param_bytes + N * C * 4),
    )
    e = pl.pallas_call(
        functools.partial(_se_gap_excite_kernel, inv_hw=inv_hw, hw=HW,
                          tile_hw=t_hw, need_mask=need_mask),
        out_shape=jax.ShapeDtypeStruct((N, C, 1), jnp.float32),
        grid=(N, grid_hw),
        in_specs=[
            pl.BlockSpec((1, C, t_hw), lambda n, t: (n, 0, t)),
            pl.BlockSpec((C, Cr), lambda n, t: (0, 0)),
            pl.BlockSpec((1, Cr), lambda n, t: (0, 0)),
            pl.BlockSpec((Cr, C), lambda n, t: (0, 0)),
            pl.BlockSpec((1, C), lambda n, t: (0, 0)),
        ],
        out_specs=pl.BlockSpec((1, C, 1), lambda n, t: (n, 0, 0)),
        scratch_shapes=[pltpu.VMEM((1, C), jnp.float32)],
        compiler_params=pltpu.CompilerParams(
            dimension_semantics=("parallel", "arbitrary"),
            vmem_limit_bytes=_vmem_limit(
                2 * tile_bytes + 2 * param_bytes + 8 * C * 4 + (2 << 20), vmem_cap),
        ),
        cost_estimate=cost_a,
    )(x_flat, w1_t, b1_2d, w2_t, b2_2d)

    cost_b = pl.CostEstimate(
        flops=int(N * C * HW),
        transcendentals=0,
        bytes_accessed=int(2 * N * C * HW * itemsize + N * C * 4),
    )
    out = pl.pallas_call(
        _se_scale_kernel,
        out_shape=jax.ShapeDtypeStruct((N, C, HW), x_nchw.dtype),
        grid=(N, grid_hw),
        in_specs=[
            pl.BlockSpec((1, C, t_hw), lambda n, t: (n, 0, t)),
            pl.BlockSpec((1, C, 1), lambda n, t: (n, 0, 0)),
        ],
        out_specs=pl.BlockSpec((1, C, t_hw), lambda n, t: (n, 0, t)),
        compiler_params=pltpu.CompilerParams(
            dimension_semantics=("parallel", "parallel"),
            vmem_limit_bytes=_vmem_limit(4 * tile_bytes + 8 * C * 4 + (2 << 20),
                                         vmem_cap),
        ),
        cost_estimate=cost_b,
    )(x_flat, e)
    return out.reshape(N, C, H, W)


def se_block_ref(x, w1, b1, w2, b2):
    """Pure-JAX reference (mirrors the PyTorch forward)."""
    gap = jnp.mean(x, axis=(2, 3))                             # [N, C]
    h = gap @ w1.T + b1
    h = h * jax.nn.sigmoid(h)                                  # swish
    e = jax.nn.sigmoid(h @ w2.T + b2)                          # [N, C]
    return x * e[:, :, None, None]


if __name__ == "__main__":
    key = jax.random.PRNGKey(0)
    N, C, H, W = 2, 4, 16, 16     # in_channels = 4
    Cr = 2                        # reduce_channels = 2

    k_x, k_w1, k_b1, k_w2, k_b2, k_x2 = jax.random.split(key, 6)
    x = jax.random.normal(k_x, (N, C, H, W), dtype=jnp.float32)
    w1 = 0.1 * jax.random.normal(k_w1, (Cr, C), dtype=jnp.float32)
    b1 = 0.1 * jax.random.normal(k_b1, (Cr,), dtype=jnp.float32)
    w2 = 0.1 * jax.random.normal(k_w2, (C, Cr), dtype=jnp.float32)
    b2 = 0.1 * jax.random.normal(k_b2, (C,), dtype=jnp.float32)

    out = jax.block_until_ready(se_block(x, w1, b1, w2, b2))
    ref = se_block_ref(x, w1, b1, w2, b2)
    assert out.shape == (N, C, H, W)
    assert jnp.allclose(out, ref, atol=1e-5, rtol=1e-5), "fused path mismatch"

    # Also exercise the large-spatial tiled fallback at a small shape,
    # including a non-multiple-of-128 spatial remainder (HW = 300 -> 128+128+44).
    C2, H2, W2 = 8, 12, 25
    x2 = jax.random.normal(k_x2, (N, C2, H2, W2), dtype=jnp.float32)
    w1b = 0.1 * jax.random.normal(k_w1, (Cr, C2), dtype=jnp.float32)
    b1b = 0.1 * jax.random.normal(k_b1, (Cr,), dtype=jnp.float32)
    w2b = 0.1 * jax.random.normal(k_w2, (C2, Cr), dtype=jnp.float32)
    b2b = 0.1 * jax.random.normal(k_b2, (C2,), dtype=jnp.float32)
    out2 = jax.block_until_ready(
        se_block(x2, w1b, b1b, w2b, b2b, force_tiled=True, tile_hw=128))
    ref2 = se_block_ref(x2, w1b, b1b, w2b, b2b)
    assert jnp.allclose(out2, ref2, atol=1e-5, rtol=1e-5), "tiled path mismatch"

    print("KERNEL_OK")
</pallas_src>

<mosaic_0001>
module attributes {stable_mosaic.version = 11 : i64} {
  func.func @_se_fused_kernel(%arg0: i32, %arg1: memref<2x4x256xf32, #tpu.memory_space<vmem>>, %arg2: memref<4x2xf32, #tpu.memory_space<vmem>>, %arg3: memref<1x2xf32, #tpu.memory_space<vmem>>, %arg4: memref<2x4xf32, #tpu.memory_space<vmem>>, %arg5: memref<1x4xf32, #tpu.memory_space<vmem>>, %arg6: memref<2x4x256xf32, #tpu.memory_space<vmem>>) attributes {dimension_semantics = [#tpu.dimension_semantics<parallel>], iteration_bounds = array<i64: 1>, scalar_prefetch = 0 : i64, scratch_operands = 0 : i64, tpu.core_type = #tpu.core_type<tc>, window_params = [{transform_indices = @transform_0, window_bounds = array<i64: 2, 4, 256>}, {pipeline_mode = #tpu.pipeline_mode<synchronous>, transform_indices = @transform_1, window_bounds = array<i64: 4, 2>}, {pipeline_mode = #tpu.pipeline_mode<synchronous>, transform_indices = @transform_2, window_bounds = array<i64: 1, 2>}, {pipeline_mode = #tpu.pipeline_mode<synchronous>, transform_indices = @transform_3, window_bounds = array<i64: 2, 4>}, {pipeline_mode = #tpu.pipeline_mode<synchronous>, transform_indices = @transform_4, window_bounds = array<i64: 1, 4>}, {transform_indices = @transform_5, window_bounds = array<i64: 2, 4, 256>}]} {
    %c0 = arith.constant 0 : index
    %c0_0 = arith.constant 0 : index
    %c0_1 = arith.constant 0 : index
    %0 = vector.load %arg1[%c0, %c0_0, %c0_1] : memref<2x4x256xf32, #tpu.memory_space<vmem>>, vector<2x4x256xf32>
    %cst = arith.constant dense<0.000000e+00> : vector<2x4xf32>
    %1 = vector.multi_reduction <add>, %0, %cst [2] : vector<2x4x256xf32> to vector<2x4xf32>
    %cst_2 = arith.constant 3.906250e-03 : f32
    %2 = vector.broadcast %cst_2 : f32 to vector<2x4xf32>
    %3 = arith.mulf %1, %2 : vector<2x4xf32>
    %c0_3 = arith.constant 0 : index
    %c0_4 = arith.constant 0 : index
    %4 = vector.load %arg2[%c0_3, %c0_4] : memref<4x2xf32, #tpu.memory_space<vmem>>, vector<4x2xf32>
    %cst_5 = arith.constant dense<0.000000e+00> : vector<2x2xf32>
    %5 = tpu.matmul %3, %4, %cst_5 {dimension_numbers = #tpu.dot_dimension_numbers<[1], [0], [0], [1], [0, 0, 1, 1], [], []>} : vector<2x4xf32>, vector<4x2xf32>, vector<2x2xf32> -> vector<2x2xf32>
    %c0_6 = arith.constant 0 : index
    %c0_7 = arith.constant 0 : index
    %6 = vector.load %arg3[%c0_6, %c0_7] : memref<1x2xf32, #tpu.memory_space<vmem>>, vector<1x2xf32>
    %7 = vector.broadcast %6 : vector<1x2xf32> to vector<2x2xf32>
    %8 = arith.addf %5, %7 : vector<2x2xf32>
    %9 = arith.negf %8 : vector<2x2xf32>
    %10 = math.exp %9 : vector<2x2xf32>
    %cst_8 = arith.constant 1.000000e+00 : f32
    %11 = vector.broadcast %cst_8 : f32 to vector<2x2xf32>
    %12 = arith.addf %11, %10 : vector<2x2xf32>
    %13 = arith.divf %11, %12 : vector<2x2xf32>
    %14 = arith.mulf %8, %13 : vector<2x2xf32>
    %c0_9 = arith.constant 0 : index
    %c0_10 = arith.constant 0 : index
    %15 = vector.load %arg4[%c0_9, %c0_10] : memref<2x4xf32, #tpu.memory_space<vmem>>, vector<2x4xf32>
    %cst_11 = arith.constant dense<0.000000e+00> : vector<2x4xf32>
    %16 = tpu.matmul %14, %15, %cst_11 {dimension_numbers = #tpu.dot_dimension_numbers<[1], [0], [0], [1], [0, 0, 1, 1], [], []>} : vector<2x2xf32>, vector<2x4xf32>, vector<2x4xf32> -> vector<2x4xf32>
    %c0_12 = arith.constant 0 : index
    %c0_13 = arith.constant 0 : index
    %17 = vector.load %arg5[%c0_12, %c0_13] : memref<1x4xf32, #tpu.memory_space<vmem>>, vector<1x4xf32>
    %18 = vector.broadcast %17 : vector<1x4xf32> to vector<2x4xf32>
    %19 = arith.addf %16, %18 : vector<2x4xf32>
    %20 = arith.negf %19 : vector<2x4xf32>
    %21 = math.exp %20 : vector<2x4xf32>
    %cst_14 = arith.constant 1.000000e+00 : f32
    %22 = vector.broadcast %cst_14 : f32 to vector<2x4xf32>
    %23 = arith.addf %22, %21 : vector<2x4xf32>
    %24 = arith.divf %22, %23 : vector<2x4xf32>
    %25 = vector.shape_cast %24 : vector<2x4xf32> to vector<2x4x1xf32>
    %26 = vector.broadcast %25 : vector<2x4x1xf32> to vector<2x4x256xf32>
    %27 = arith.mulf %0, %26 : vector<2x4x256xf32>
    %c0_15 = arith.constant 0 : index
    %c0_16 = arith.constant 0 : index
    %c0_17 = arith.constant 0 : index
    %28 = vector.load %arg6[%c0_15, %c0_16, %c0_17] : memref<2x4x256xf32, #tpu.memory_space<vmem>>, vector<2x4x256xf32>
    tpu.vector_store %arg6[%c0_15, %c0_16, %c0_17], %27 {strides = array<i32>} : memref<2x4x256xf32, #tpu.memory_space<vmem>>, vector<2x4x256xf32>,
    return
  }
  func.func @transform_0(%arg0: i32) -> (i32, i32, i32) {
    %c0_i32 = arith.constant 0 : i32
    %c0_i32_0 = arith.constant 0 : i32
    %c0_i32_1 = arith.constant 0 : i32
    return %arg0, %c0_i32, %c0_i32_0 : i32, i32, i32
  }
  func.func @transform_1(%arg0: i32) -> (i32, i32) {
    %c0_i32 = arith.constant 0 : i32
    %c0_i32_0 = arith.constant 0 : i32
    %c0_i32_1 = arith.constant 0 : i32
    return %c0_i32, %c0_i32_0 : i32, i32
  }
  func.func @transform_2(%arg0: i32) -> (i32, i32) {
    %c0_i32 = arith.constant 0 : i32
    %c0_i32_0 = arith.constant 0 : i32
    %c0_i32_1 = arith.constant 0 : i32
    return %c0_i32, %c0_i32_0 : i32, i32
  }
  func.func @transform_3(%arg0: i32) -> (i32, i32) {
    %c0_i32 = arith.constant 0 : i32
    %c0_i32_0 = arith.constant 0 : i32
    %c0_i32_1 = arith.constant 0 : i32
    return %c0_i32, %c0_i32_0 : i32, i32
  }
  func.func @transform_4(%arg0: i32) -> (i32, i32) {
    %c0_i32 = arith.constant 0 : i32
    %c0_i32_0 = arith.constant 0 : i32
    %c0_i32_1 = arith.constant 0 : i32
    return %c0_i32, %c0_i32_0 : i32, i32
  }
  func.func @transform_5(%arg0: i32) -> (i32, i32, i32) {
    %c0_i32 = arith.constant 0 : i32
    %c0_i32_0 = arith.constant 0 : i32
    %c0_i32_1 = arith.constant 0 : i32
    return %arg0, %c0_i32, %c0_i32_0 : i32, i32, i32
  }
}

</mosaic_0001>

<bundles_post_ra>
// kernel: tpu_custom_call.1
= control target key start
LH: loop header
LB: loop body
LE: loop exit
PB: predicated region body
PF: predicated region fallthrough
CT: control target
= control target key end

     0   :  { %10 = vsyncpa [#allocation3], 0  ;;  %s489_s0 = inlined_call_operand.hbm [shape: f32[2,4,256], index: 0, kind: input, shape index: {}]   ;;  %s490_s1 = inlined_call_operand.vmem [shape: f32[4,2], index: 1, kind: input, shape index: {}]   ;;  %s491_s2 = inlined_call_operand.vmem [shape: f32[1,2], index: 2, kind: input, shape index: {}]   ;;  %s492_s3 = inlined_call_operand.vmem [shape: f32[2,4], index: 3, kind: input, shape index: {}]   ;;  %s493_s4 = inlined_call_operand.vmem [shape: f32[1,4], index: 4, kind: input, shape index: {}]   ;;  %s494_s5 = inlined_call_operand.hbm [shape: f32[2,4,256], index: 5, kind: output, shape index: {}]  }
   0x1   :  { %11 = vsyncpa [#allocation4], 0  ;;  %s393_s18 = smov [#allocation2]   ;;  %s345_s22 = scalar_lea.hbm %s489_s0, 256 }
   0x2   :  { %s17_s19 = sshll.u32 %s393_s18, 4  ;;  %p346_p0 = scmp.ne.s32.totalorder %s489_s0, %s345_s22  ;;  %s18_s19 = int_to_ptr.vmem [resolvable:$true] %s17_s19 }
   0x3   :  { %p349_p1 = scmp.lt.u32.totalorder %s345_s22, %s489_s0 }
   0x5   :  { %p351_p2 = pnand %p349_p1, %p346_p0 }
   0x7   :  { %354 = shalt.err (!%p351_p2)
}
   0x8   :  { %s355_s27 = scalar_lea.vmem %s18_s19, 256  ;;  %p360_p4 = scmp.lt.s32.totalorder %s18_s19, %s18_s19 }
   0x9   :  { %p356_p3 = scmp.ne.s32.totalorder %s18_s19, %s355_s27  ;;  %p361_p5 = scmp.lt.s32.totalorder %s355_s27, %s355_s27 }
   0xb   :  { %p362_p6 = por %p361_p5, %p360_p4 }
   0xd   :  { %p363_p7 = pnand %p362_p6, %p356_p3 }
   0xf   :  { %366 = shalt.err (!%p363_p7)
}
  0x10   :  { %s394_s28 = smov 128   ;;  %s395_s29 = smov 8  }
  0x11   :  { %23 = dma.hbm_to_vmem [thread:$0]  %s489_s0, 256, %s18_s19, [#allocation3], %s394_s28, %s394_s28, %s395_s29  }
  0x12   :  { %389 = dma.done.wait [#allocation3], 256  }
  0x13   :  { %390 = vsyncadd [#allocation3], 4294967040  ;;  %vm43_vm0 = vcmask 1043456   ;;  %v445_v0 = vld [vmem:[#allocation2] sm:$0xff]  ;;  %v447_v1 = vld [vmem:[#allocation2 + $0x8] sm:$0xff]  ;;  %v396_v11 = vmov 0.0   ;;  %v66_v12 = vlaneseq }
  0x14   :  { %v39_v2 = vcombine.high %v445_v0, %v445_v0  ;;  %v44_v3 = vsel %vm43_vm0, %v445_v0, 0.0  ;;  %v40_v4 = vcombine.high %v447_v1, %v447_v1  ;;  %v49_v6 = vsel %vm43_vm0, %v447_v1, 0.0  ;;  %v56_v10 = vld [vmem:[%s490_s1] sm:$0xf]  ;;  %318 = vmatprep.subr.mxu0 %v396_v11  ;;  %323 = vmatprep.subr.mxu1 %v396_v11 }
  0x15   :  { %vm397_vm1 = vmmov 0   ;;  %319 = vmatpush3.msk.msra.mxu0 %vm43_vm0, %v56_v10  ;;  %v67_v13 = vand.u32 127, %v66_v12  ;;  %v69_v14 = vshrl.u32 %v66_v12, 7  ;;  %vm76_vm2 = vcmask 1041409   ;;  %v161_v23 = vld [vmem:[%s492_s3] sm:$0x3] }
  0x16   :  { %v45_v5 = vsel %vm43_vm0, %v39_v2, 0.0  ;;  %v50_v7 = vsel %vm43_vm0, %v40_v4, 0.0  ;;  %320 = vmatprep.mubr.msk.f32.mxu0 %vm397_vm1, %v396_v11  ;;  %325 = vmatprep.mubr.msk.f32.mxu1 %vm397_vm1, %v396_v11  ;;  %vm78_vm3 = vcmask 31744   ;;  %vm173_vm4 = vcmask 1041408   ;;  %v306_v24 = vld [vmem:[%s491_s2] ss:$0 sm:$0xff] }
  0x17   :  { %v46_v8 = vadd.f32 %v45_v5, %v44_v3  ;;  %v51_v9 = vadd.f32 %v50_v7, %v49_v6  ;;  %v70_v16 = vsub.s32 %v67_v13, %v69_v14  ;;  %324 = vmatpush3.msk.msra.mxu1 %vm173_vm4, %v161_v23  ;;  %vm169_vm5 = vcmask 15360   ;;  %v310_v33 = vld [vmem:[%s493_s4] ss:$0 sm:$0xff]  ;;  %s399_s2 = smov [#allocation5]  }
  0x18   :  { %v255_v40 = vsub.s32 0, %v69_v14  ;;  %v262_v43 = vsub.s32 1, %v69_v14  ;;  %v398_v45 = vmov 839922192   ;;  %s294_s4 = sshll.u32 %s399_s2, 4  ;;  %s295_s4 = int_to_ptr.vmem [resolvable:$true] %s294_s4 }
  0x19   :  { %47 = vadd.xlane.f32.xlu0 %v46_v8  ;;  %v270_v46 = vunpack.c.l.s4 %v398_v45  ;;  %s367_s12 = scalar_lea.vmem %s295_s4, 256  ;;  %p372_p9 = scmp.lt.s32.totalorder %s295_s4, %s295_s4 }
  0x1a   :  { %p368_p8 = scmp.ne.s32.totalorder %s295_s4, %s367_s12  ;;  %p373_p10 = scmp.lt.s32.totalorder %s367_s12, %s367_s12 }
  0x1b   :  { %v271_v47 = vunpack.c.0.s8 %v270_v46 }
  0x1c   :  { %p374_p11 = por %p373_p10, %p372_p9 }
  0x1d   :  { %52 = vadd.xlane.f32.xlu0 %v51_v9  ;;  %v274_v48 = vsub.s32 %v271_v47, %v69_v14 }
  0x1e   :  { %p375_p12 = pnand %p374_p11, %p368_p8 }
  0xa6   :  { %v48_v15 = vpop.xlane.xlu0 %47 }
  0xa7   :  { %v54_v17 = vmul.f32 0.00390625, %v48_v15 }
  0xa9   :  { %v71_v20 = vrot.slane %v54_v17, %v70_v16 }
  0xaa   :  { %v53_v18 = vpop.xlane.xlu0 %52 }
  0xab   :  { %v55_v19 = vmul.f32 0.00390625, %v53_v18 }
  0xad   :  { %v75_v21 = vrot.slane %v55_v19, %v70_v16 }
  0xaf   :  { %v77_v22 = vsel %vm76_vm2, %v75_v21, %v71_v20 }
  0xb0   :  { %321 = vmatmul.mubr.msk.f32.vlgmr.msra.gmra.mrb[0].mxu0 %vm78_vm3, %v77_v22 }
 0x183   :  { %v150_v25 = vpop.f32.mrb[0].mxu0 }
 0x184   :  { %v151_v26 = vadd.f32 %v306_v24, %v150_v25  ;;  %v322_v27 = vpop.f32.mrb[1].mxu0 }
 0x186   :  { %v309_v28 = vmul.f32 -1.442695, %v151_v26 }
 0x188   :  { %337 = vpow2.f32 %v309_v28 }
 0x192   :  { %v338_v29 = vpop.eup %337 }
 0x193   :  { %v157_v30 = vadd.f32 1.0, %v338_v29 }
 0x195   :  { %339 = vrcp.f32 %v157_v30 }
 0x19f   :  { %v340_v31 = vpop.eup %339 }
 0x1a0   :  { %v160_v32 = vmul.f32 %v340_v31, %v151_v26 }
 0x1a2   :  { %326 = vmatmul.mubr.msk.f32.vlgmr.msra.gmra.mrb[0].mxu1 %vm169_vm5, %v160_v32 }
 0x275   :  { %v243_v34 = vpop.f32.mrb[0].mxu1 }
 0x276   :  { %v244_v35 = vadd.f32 %v310_v33, %v243_v34  ;;  %v327_v36 = vpop.f32.mrb[1].mxu1 }
 0x278   :  { %v313_v37 = vmul.f32 -1.442695, %v244_v35 }
 0x27a   :  { %341 = vpow2.f32 %v313_v37 }
 0x284   :  { %v342_v38 = vpop.eup %341 }
 0x285   :  { %v250_v39 = vadd.f32 1.0, %v342_v38 }
 0x287   :  { %343 = vrcp.f32 %v250_v39 }
 0x291   :  { %v344_v41 = vpop.eup %343 }
 0x292   :  { %v256_v42 = vrot.slane %v344_v41, %v255_v40  ;;  %v263_v44 = vrot.slane %v344_v41, %v262_v43 }
 0x294   :  { %258 = vbcast.lane.b32.xlu1 %v256_v42, 256 }
 0x298   :  { %265 = vbcast.lane.b32.xlu1 %v263_v44, 256 }
 0x306   :  { %v259_v49 = vpop.permute.xlu1 %258 }
 0x307   :  { %v275_v50 = vrot.slane %v259_v49, %v274_v48 }
 0x309   :  { %v285_v51 = vmul.f32 %v275_v50, %v445_v0 }
 0x30a   :  { %v266_v52 = vpop.permute.xlu1 %265 }
 0x30b   :  { %287 = vst [vmem:[#allocation5] sm:$0xff] %v285_v51  ;;  %v282_v53 = vrot.slane %v266_v52, %v274_v48 }
 0x30d   :  { %v286_v54 = vmul.f32 %v282_v53, %v447_v1 }
 0x30f   :  { %288 = vst [vmem:[#allocation5 + $0x8] sm:$0xff] %v286_v54 }
 0x310   :  { %378 = shalt.err (!%p375_p12)
}
 0x311   :  { %s379_s15 = scalar_lea.hbm %s494_s5, 256 }
 0x312   :  { %p380_p13 = scmp.ne.s32.totalorder %s494_s5, %s379_s15  ;;  %p383_p0 = scmp.lt.u32.totalorder %s379_s15, %s494_s5 }
 0x314   :  { %p385_p1 = pnand %p383_p0, %p380_p13 }
 0x316   :  { %388 = shalt.err (!%p385_p1)
}
 0x317   :  { %300 = dma.vmem_to_hbm [thread:$0]  %s295_s4, 256, %s494_s5, [#allocation4], %s394_s28, %s394_s28, %s395_s29  }
 0x318   :  { %391 = dma.done.wait [#allocation4], 256  }
 0x319   :  { %392 = vsyncadd [#allocation4], 4294967040 }
 0x31a   :  { %304 = vsyncpa [#allocation3], 1 }
 0x31b   :  { %305 = vsyncpa [#allocation4], 1 }

</bundles_post_ra>
